<compile_context>
chip_gen: v7x
topology: tpu7x:2x2x1
jax: 0.10.0
libtpu: 0.0.40
codegen_flags: <defaults>
</compile_context>

<pallas_src>
import jax
import jax.numpy as jnp
from jax.experimental import pallas as pl
from jax.experimental.pallas import tpu as pltpu

_SUBLANE = 8
_MAX_BLOCK_B = 4096  # rows per batch tile; ~2.6 MB/step, fits v5e/v6e/v7x scoped VMEM


def _round_up(x, m):
    return ((x + m - 1) // m) * m


def _mlp_kernel(x_ref, w1_ref, b1_ref, w2_ref, b2_ref, w3_ref, b3_ref, o_ref):
    # Whole forward for one batch tile, fused in VMEM.  Everything f32.
    x = x_ref[...]                                                    # (bb, in)
    h1 = jnp.dot(x, w1_ref[...], preferred_element_type=jnp.float32) + b1_ref[...]
    h1 = jnp.maximum(h1, 0.0)                                         # ReLU
    h2 = jnp.dot(h1, w2_ref[...], preferred_element_type=jnp.float32) + b2_ref[...]
    h2 = jnp.maximum(h2, 0.0)                                         # ReLU
    # fc3: out_dim == 1 -> broadcast multiply + lane reduce, avoids N=1 matmul.
    z = jnp.sum(h2 * w3_ref[...], axis=-1, keepdims=True) + b3_ref[...]
    o_ref[...] = jax.nn.sigmoid(z)                                    # (bb, 1)


def _batch_tiling(B):
    """Return (block_b, padded_B, grid_steps)."""
    if B <= _MAX_BLOCK_B:
        # Single tile: no benefit splitting a small batch on 1-TC chips; pad at
        # most 7 rows so the sublane dim is a multiple of 8.
        B_p = _round_up(B, _SUBLANE)
        return B_p, B_p, 1
    # Large batch: no batch padding (boundary block is read/write clamped by
    # Pallas); even step count so v7x megacore ('parallel' axis) stays balanced.
    steps = pl.cdiv(B, _MAX_BLOCK_B)
    if steps % 2:
        steps += 1
    block_b = _round_up(pl.cdiv(B, steps), _SUBLANE)
    return block_b, B, pl.cdiv(B, block_b)


@jax.jit
def network_forward(x, w1, b1, w2, b2, w3, b3):
    """x: (B, in).  Weights stored transposed vs PyTorch: W_i is (in, out), so
    this computes x @ W + b == nn.Linear(x).  Biases are (1, out)."""
    B, in_dim = x.shape
    h1_dim = w1.shape[1]
    h2_dim = w2.shape[1]

    block_b, B_p, steps = _batch_tiling(B)
    if B_p != B:
        x = jnp.pad(x, ((0, B_p - B), (0, 0)))       # <8 rows, small-B path only

    w3_row = w3.reshape(1, h2_dim)                    # (h2, 1) -> (1, h2), 128 B
    b3_sc = b3.reshape(1, 1)

    # Unpadded cost estimate for the XLA scheduler.
    flops = 2 * B * (in_dim * h1_dim + h1_dim * h2_dim + h2_dim)
    bytes_accessed = 4 * (B_p * in_dim + in_dim * h1_dim + h1_dim
                          + h1_dim * h2_dim + h2_dim + h2_dim + 1 + B_p)
    cost = pl.CostEstimate(flops=flops, transcendentals=B,
                           bytes_accessed=bytes_accessed)

    in_specs = [
        pl.BlockSpec((block_b, in_dim), lambda i: (i, 0)),   # x: batch-tiled raw f32
        # weights / biases: grid-invariant, VMEM resident
        pl.BlockSpec((in_dim, h1_dim), lambda i: (0, 0)),
        pl.BlockSpec((1, h1_dim), lambda i: (0, 0)),
        pl.BlockSpec((h1_dim, h2_dim), lambda i: (0, 0)),
        pl.BlockSpec((1, h2_dim), lambda i: (0, 0)),
        pl.BlockSpec((1, h2_dim), lambda i: (0, 0)),         # w3 as a (1, h2) row
        pl.BlockSpec((1, 1), lambda i: (0, 0)),
    ]
    out_specs = pl.BlockSpec((block_b, 1), lambda i: (i, 0))  # narrow (B, 1) output

    out = pl.pallas_call(
        _mlp_kernel,
        out_shape=jax.ShapeDtypeStruct((B_p, 1), jnp.float32),
        grid=(steps,),
        in_specs=in_specs,
        out_specs=out_specs,
        compiler_params=pltpu.CompilerParams(
            dimension_semantics=("parallel",),
        ),
        cost_estimate=cost,
    )(x, w1, b1, w2, b2, w3_row, b3_sc)

    return out if B_p == B else out[:B]


def init_linear_params(key, in_features, out_features):
    # Mimic torch.nn.Linear default init: U(-1/sqrt(in), 1/sqrt(in)).
    kw, kb = jax.random.split(key)
    bound = 1.0 / jnp.sqrt(jnp.float32(in_features))
    # Stored as (in, out) so the kernel computes x @ W.
    w = jax.random.uniform(kw, (in_features, out_features), jnp.float32, -bound, bound)
    b = jax.random.uniform(kb, (1, out_features), jnp.float32, -bound, bound)
    return w, b


if __name__ == "__main__":
    # Network(input_size=32, n_hidden1=64, n_hidden2=32); output_size = 1
    input_size, n_hidden1, n_hidden2, output_size = 32, 64, 32, 1
    batch = 16

    key = jax.random.PRNGKey(0)
    kx, k1, k2, k3 = jax.random.split(key, 4)

    x = jax.random.normal(kx, (batch, input_size), jnp.float32)
    w1, b1 = init_linear_params(k1, input_size, n_hidden1)
    w2, b2 = init_linear_params(k2, n_hidden1, n_hidden2)
    w3, b3 = init_linear_params(k3, n_hidden2, output_size)

    out = network_forward(x, w1, b1, w2, b2, w3, b3)
    out = jax.block_until_ready(out)
    assert out.shape == (batch, output_size)

    # Full-precision f32 reference forward (mirrors the PyTorch module).
    h1r = jnp.maximum(x @ w1 + b1, 0.0)
    h2r = jnp.maximum(h1r @ w2 + b2, 0.0)
    ref = jax.nn.sigmoid(h2r @ w3 + b3)
    assert jnp.allclose(out, ref, atol=5e-3, rtol=0.0), float(jnp.max(jnp.abs(out - ref)))

    print("KERNEL_OK")
</pallas_src>

<mosaic_0001>
module attributes {stable_mosaic.version = 11 : i64} {
  func.func @_mlp_kernel(%arg0: i32, %arg1: memref<16x32xf32, #tpu.memory_space<vmem>>, %arg2: memref<32x64xf32, #tpu.memory_space<vmem>>, %arg3: memref<1x64xf32, #tpu.memory_space<vmem>>, %arg4: memref<64x32xf32, #tpu.memory_space<vmem>>, %arg5: memref<1x32xf32, #tpu.memory_space<vmem>>, %arg6: memref<1x32xf32, #tpu.memory_space<vmem>>, %arg7: memref<1x1xf32, #tpu.memory_space<vmem>>, %arg8: memref<16x1xf32, #tpu.memory_space<vmem>>) attributes {dimension_semantics = [#tpu.dimension_semantics<parallel>], iteration_bounds = array<i64: 1>, scalar_prefetch = 0 : i64, scratch_operands = 0 : i64, tpu.core_type = #tpu.core_type<tc>, window_params = [{transform_indices = @transform_0, window_bounds = array<i64: 16, 32>}, {pipeline_mode = #tpu.pipeline_mode<synchronous>, transform_indices = @transform_1, window_bounds = array<i64: 32, 64>}, {pipeline_mode = #tpu.pipeline_mode<synchronous>, transform_indices = @transform_2, window_bounds = array<i64: 1, 64>}, {pipeline_mode = #tpu.pipeline_mode<synchronous>, transform_indices = @transform_3, window_bounds = array<i64: 64, 32>}, {pipeline_mode = #tpu.pipeline_mode<synchronous>, transform_indices = @transform_4, window_bounds = array<i64: 1, 32>}, {pipeline_mode = #tpu.pipeline_mode<synchronous>, transform_indices = @transform_5, window_bounds = array<i64: 1, 32>}, {pipeline_mode = #tpu.pipeline_mode<synchronous>, transform_indices = @transform_6, window_bounds = array<i64: 1, 1>}, {transform_indices = @transform_7, window_bounds = array<i64: 16, 1>}]} {
    %c0 = arith.constant 0 : index
    %c0_0 = arith.constant 0 : index
    %0 = vector.load %arg1[%c0, %c0_0] : memref<16x32xf32, #tpu.memory_space<vmem>>, vector<16x32xf32>
    %c0_1 = arith.constant 0 : index
    %c0_2 = arith.constant 0 : index
    %1 = vector.load %arg2[%c0_1, %c0_2] : memref<32x64xf32, #tpu.memory_space<vmem>>, vector<32x64xf32>
    %cst = arith.constant dense<0.000000e+00> : vector<16x64xf32>
    %2 = tpu.matmul %0, %1, %cst {dimension_numbers = #tpu.dot_dimension_numbers<[1], [0], [0], [1], [0, 0, 1, 1], [], []>} : vector<16x32xf32>, vector<32x64xf32>, vector<16x64xf32> -> vector<16x64xf32>
    %c0_3 = arith.constant 0 : index
    %c0_4 = arith.constant 0 : index
    %3 = vector.load %arg3[%c0_3, %c0_4] : memref<1x64xf32, #tpu.memory_space<vmem>>, vector<1x64xf32>
    %4 = vector.broadcast %3 : vector<1x64xf32> to vector<16x64xf32>
    %5 = arith.addf %2, %4 : vector<16x64xf32>
    %cst_5 = arith.constant 0.000000e+00 : f32
    %6 = vector.broadcast %cst_5 : f32 to vector<16x64xf32>
    %7 = arith.maximumf %5, %6 : vector<16x64xf32>
    %c0_6 = arith.constant 0 : index
    %c0_7 = arith.constant 0 : index
    %8 = vector.load %arg4[%c0_6, %c0_7] : memref<64x32xf32, #tpu.memory_space<vmem>>, vector<64x32xf32>
    %cst_8 = arith.constant dense<0.000000e+00> : vector<16x32xf32>
    %9 = tpu.matmul %7, %8, %cst_8 {dimension_numbers = #tpu.dot_dimension_numbers<[1], [0], [0], [1], [0, 0, 1, 1], [], []>} : vector<16x64xf32>, vector<64x32xf32>, vector<16x32xf32> -> vector<16x32xf32>
    %c0_9 = arith.constant 0 : index
    %c0_10 = arith.constant 0 : index
    %10 = vector.load %arg5[%c0_9, %c0_10] : memref<1x32xf32, #tpu.memory_space<vmem>>, vector<1x32xf32>
    %11 = vector.broadcast %10 : vector<1x32xf32> to vector<16x32xf32>
    %12 = arith.addf %9, %11 : vector<16x32xf32>
    %cst_11 = arith.constant 0.000000e+00 : f32
    %13 = vector.broadcast %cst_11 : f32 to vector<16x32xf32>
    %14 = arith.maximumf %12, %13 : vector<16x32xf32>
    %c0_12 = arith.constant 0 : index
    %c0_13 = arith.constant 0 : index
    %15 = vector.load %arg6[%c0_12, %c0_13] : memref<1x32xf32, #tpu.memory_space<vmem>>, vector<1x32xf32>
    %16 = vector.broadcast %15 : vector<1x32xf32> to vector<16x32xf32>
    %17 = arith.mulf %14, %16 : vector<16x32xf32>
    %cst_14 = arith.constant dense<0.000000e+00> : vector<16xf32>
    %18 = vector.multi_reduction <add>, %17, %cst_14 [1] : vector<16x32xf32> to vector<16xf32>
    %19 = vector.shape_cast %18 : vector<16xf32> to vector<16x1xf32>
    %c0_15 = arith.constant 0 : index
    %c0_16 = arith.constant 0 : index
    %20 = vector.load %arg7[%c0_15, %c0_16] : memref<1x1xf32, #tpu.memory_space<vmem>>, vector<1x1xf32>
    %21 = vector.broadcast %20 : vector<1x1xf32> to vector<16x1xf32>
    %22 = arith.addf %19, %21 : vector<16x1xf32>
    %23 = arith.negf %22 : vector<16x1xf32>
    %24 = math.exp %23 : vector<16x1xf32>
    %cst_17 = arith.constant 1.000000e+00 : f32
    %25 = vector.broadcast %cst_17 : f32 to vector<16x1xf32>
    %26 = arith.addf %25, %24 : vector<16x1xf32>
    %27 = arith.divf %25, %26 : vector<16x1xf32>
    %c0_18 = arith.constant 0 : index
    %c0_19 = arith.constant 0 : index
    %28 = vector.load %arg8[%c0_18, %c0_19] : memref<16x1xf32, #tpu.memory_space<vmem>>, vector<16x1xf32>
    tpu.vector_store %arg8[%c0_18, %c0_19], %27 {strides = array<i32>} : memref<16x1xf32, #tpu.memory_space<vmem>>, vector<16x1xf32>,
    return
  }
  func.func @transform_0(%arg0: i32) -> (i32, i32) {
    %c0_i32 = arith.constant 0 : i32
    %c0_i32_0 = arith.constant 0 : i32
    return %arg0, %c0_i32 : i32, i32
  }
  func.func @transform_1(%arg0: i32) -> (i32, i32) {
    %c0_i32 = arith.constant 0 : i32
    %c0_i32_0 = arith.constant 0 : i32
    %c0_i32_1 = arith.constant 0 : i32
    return %c0_i32, %c0_i32_0 : i32, i32
  }
  func.func @transform_2(%arg0: i32) -> (i32, i32) {
    %c0_i32 = arith.constant 0 : i32
    %c0_i32_0 = arith.constant 0 : i32
    %c0_i32_1 = arith.constant 0 : i32
    return %c0_i32, %c0_i32_0 : i32, i32
  }
  func.func @transform_3(%arg0: i32) -> (i32, i32) {
    %c0_i32 = arith.constant 0 : i32
    %c0_i32_0 = arith.constant 0 : i32
    %c0_i32_1 = arith.constant 0 : i32
    return %c0_i32, %c0_i32_0 : i32, i32
  }
  func.func @transform_4(%arg0: i32) -> (i32, i32) {
    %c0_i32 = arith.constant 0 : i32
    %c0_i32_0 = arith.constant 0 : i32
    %c0_i32_1 = arith.constant 0 : i32
    return %c0_i32, %c0_i32_0 : i32, i32
  }
  func.func @transform_5(%arg0: i32) -> (i32, i32) {
    %c0_i32 = arith.constant 0 : i32
    %c0_i32_0 = arith.constant 0 : i32
    %c0_i32_1 = arith.constant 0 : i32
    return %c0_i32, %c0_i32_0 : i32, i32
  }
  func.func @transform_6(%arg0: i32) -> (i32, i32) {
    %c0_i32 = arith.constant 0 : i32
    %c0_i32_0 = arith.constant 0 : i32
    %c0_i32_1 = arith.constant 0 : i32
    return %c0_i32, %c0_i32_0 : i32, i32
  }
  func.func @transform_7(%arg0: i32) -> (i32, i32) {
    %c0_i32 = arith.constant 0 : i32
    %c0_i32_0 = arith.constant 0 : i32
    return %arg0, %c0_i32 : i32, i32
  }
}

</mosaic_0001>

<bundles_post_ra>
// kernel: network_forward.1
= control target key start
LH: loop header
LB: loop body
LE: loop exit
PB: predicated region body
PF: predicated region fallthrough
CT: control target
= control target key end

     0   :  { %vm41_vm0 = vcmask 261120   ;;  %vm140_vm1 = vcmask 523264   ;;  %vm260_vm2 = vcmask 7168   ;;  %s459_s1 = inlined_call_operand.vmem [shape: f32[32,64], index: 1, kind: input, shape index: {}]   ;;  %s460_s0 = inlined_call_operand.vmem [shape: f32[16,32], index: 0, kind: input, shape index: {}]   ;;  %s461_s3 = inlined_call_operand.vmem [shape: f32[64,32], index: 3, kind: input, shape index: {}]   ;;  %s462_s2 = inlined_call_operand.vmem [shape: f32[1,64], index: 2, kind: input, shape index: {}]   ;;  %s463_s6 = inlined_call_operand.<no memory space> [shape: f32[1,1], index: 6, kind: input, shape index: {}]   ;;  %s464_s4 = inlined_call_operand.vmem [shape: f32[1,32], index: 4, kind: input, shape index: {}]   ;;  %s465_s5 = inlined_call_operand.vmem [shape: f32[1,32], index: 5, kind: input, shape index: {}]   ;;  %s466_s7 = inlined_call_operand.vmem [shape: f32[16,1], index: 7, kind: output, shape index: {}]  }
   0x1   :  { %v30_v0 = vld [vmem:[%s459_s1] sm:$0xff]  ;;  %v31_v1 = vld [vmem:[%s459_s1 + $0x8] sm:$0xff]  ;;  %v32_v2 = vld [vmem:[%s459_s1 + $0x10] sm:$0xff]  ;;  %v12_v27 = vstv %s463_s6 }
   0x2   :  { %v323_v3 = vpack.c.bf16 %v31_v1, %v30_v0  ;;  %v33_v4 = vld [vmem:[%s459_s1 + $0x18] sm:$0xff]  ;;  %v28_v5 = vld [vmem:[%s460_s0] sm:$0xff]  ;;  %v126_v8 = vld [vmem:[%s461_s3 + $0x8] sm:$0xff]  ;;  %13 = vst [vmem:[#allocation2] sm:$0x1] %v12_v27 }
   0x3   :  { %v327_v6 = vpack.c.bf16 %v33_v4, %v32_v2  ;;  %301 = vmatprep.mubr.msk.f32.mxu0 %vm41_vm0, %v28_v5  ;;  %v125_v7 = vld [vmem:[%s461_s3] sm:$0xff]  ;;  %v127_v9 = vld [vmem:[%s461_s3 + $0x10] sm:$0xff]  ;;  %v128_v11 = vld [vmem:[%s461_s3 + $0x18] sm:$0xff] }
   0x4   :  { %324 = vmatprep.subr.bf16.mxu0 %v323_v3  ;;  %v331_v10 = vpack.c.bf16 %v126_v8, %v125_v7  ;;  %v335_v12 = vpack.c.bf16 %v128_v11, %v127_v9  ;;  %v129_v13 = vld [vmem:[%s461_s3 + $0x20] sm:$0xff]  ;;  %v130_v14 = vld [vmem:[%s461_s3 + $0x28] sm:$0xff]  ;;  %v131_v17 = vld [vmem:[%s461_s3 + $0x30] sm:$0xff] }
   0x5   :  { %326 = vmatpush3.bf16.msra.mxu0 %v323_v3  ;;  %v339_v15 = vpack.c.bf16 %v130_v14, %v129_v13  ;;  %v29_v16 = vld [vmem:[%s460_s0 + $0x8] sm:$0xff]  ;;  %v132_v18 = vld [vmem:[%s461_s3 + $0x38] sm:$0xff]  ;;  %v267_v20 = vld [vmem:[%s462_s2] ss:$0 sm:$0xff] }
   0x6   :  { %328 = vmatprep.subr.bf16.mxu0 %v327_v6  ;;  %332 = vmatprep.subr.bf16.mxu1 %v331_v10  ;;  %v343_v19 = vpack.c.bf16 %v132_v18, %v131_v17  ;;  %v270_v28 = vld [vmem:[%s464_s4] ss:$0 sm:$0xff] }
   0x7   :  { %334 = vmatpush3.bf16.msra.mxu1 %v331_v10  ;;  %v273_v33 = vld [vmem:[%s465_s5] ss:$0 sm:$0xff] }
   0x8   :  { %336 = vmatprep.subr.bf16.mxu1 %v335_v12 }
   0x9   :  { %330 = vmatpush3.bf16.msra.mxu0 %v327_v6  ;;  %v274_v40 = vld [vmem:[#allocation2] ss:$0 sm:$0xff] }
   0xb   :  { %338 = vmatpush3.bf16.msra.mxu1 %v335_v12 }
   0xc   :  { %302 = vmatmul.mubr.msk.f32.vlgmr.msra.gmra.mrb[0].mxu0 %vm41_vm0, %v29_v16  ;;  %340 = vmatprep.subr.bf16.mxu1 %v339_v15 }
   0xf   :  { %342 = vmatpush3.bf16.msra.mxu1 %v339_v15 }
  0x10   :  { %344 = vmatprep.subr.bf16.mxu1 %v343_v19 }
  0x13   :  { %346 = vmatpush3.bf16.msra.mxu1 %v343_v19 }
  0xdf   :  { %v303_v21 = vpop.f32.mrb[0].mxu0 }
  0xe0   :  { %v120_v22 = vadd.f32 %v303_v21, %v267_v20  ;;  %v114_v23 = vpop.f32.mrb[1].mxu0 }
  0xe1   :  { %v115_v24 = vadd.f32 %v267_v20, %v114_v23 }
  0xe2   :  { %v124_v26 = vmax.f32 %v120_v22, 0.0 }
  0xe3   :  { %v123_v25 = vmax.f32 %v115_v24, 0.0 }
  0xe5   :  { %320 = vmatprep.mubr.msk.f32.mxu1 %vm140_vm1, %v123_v25 }
  0xe6   :  { %321 = vmatmul.mubr.msk.f32.vlgmr.msra.gmra.mrb[0].mxu1 %vm140_vm1, %v124_v26 }
 0x1b9   :  { %v322_v29 = vpop.f32.mrb[0].mxu1 }
 0x1ba   :  { %v219_v30 = vadd.f32 %v322_v29, %v270_v28  ;;  %v213_v31 = vpop.f32.mrb[1].mxu1 }
 0x1bb   :  { %v214_v32 = vadd.f32 %v270_v28, %v213_v31 }
 0x1bc   :  { %v223_v34 = vmax.f32 %v219_v30, 0.0 }
 0x1bd   :  { %v222_v35 = vmax.f32 %v214_v32, 0.0 }
 0x1be   :  { %v232_v38 = vmul.f32 %v273_v33, %v223_v34 }
 0x1bf   :  { %v231_v36 = vmul.f32 %v273_v33, %v222_v35 }
 0x1c0   :  { %v236_v39 = vsel %vm41_vm0, %v232_v38, 0.0 }
 0x1c1   :  { %v233_v37 = vsel %vm41_vm0, %v231_v36, 0.0 }
 0x1c2   :  { %234 = vadd.xlane.f32.xlu0 %v233_v37 }
 0x1c6   :  { %237 = vadd.xlane.f32.xlu0 %v236_v39 }
 0x24f   :  { %v235_v41 = vpop.xlane.xlu0 %234 }
 0x250   :  { %v246_v42 = vadd.f32 %v274_v40, %v235_v41 }
 0x252   :  { %v275_v43 = vmul.f32 -1.442695, %v246_v42 }
 0x253   :  { %v238_v44 = vpop.xlane.xlu0 %237 }
 0x254   :  { %347 = vpow2.f32 %v275_v43  ;;  %v247_v45 = vadd.f32 %v274_v40, %v238_v44 }
 0x256   :  { %v276_v46 = vmul.f32 -1.442695, %v247_v45 }
 0x258   :  { %349 = vpow2.f32 %v276_v46 }
 0x25e   :  { %v348_v47 = vpop.eup %347 }
 0x25f   :  { %v254_v48 = vadd.f32 1.0, %v348_v47 }
 0x261   :  { %351 = vrcp.f32 %v254_v48 }
 0x262   :  { %v350_v49 = vpop.eup %349 }
 0x263   :  { %v255_v50 = vadd.f32 1.0, %v350_v49 }
 0x265   :  { %353 = vrcp.f32 %v255_v50 }
 0x26b   :  { %v352_v51 = vpop.eup %351 }
 0x26c   :  { %261 = vst.msk [vmem:[%s466_s7] sm:$0xff] %vm260_vm2, %v352_v51 }
 0x26f   :  { %v354_v52 = vpop.eup %353 }
 0x270   :  { %262 = vst.msk [vmem:[%s466_s7 + $0x8] sm:$0xff] %vm260_vm2, %v354_v52 }

</bundles_post_ra>
